<compile_context>
chip_gen: v5e
topology: v5e:2x2
jax: 0.10.0
libtpu: 0.0.40
codegen_flags: <defaults>
</compile_context>

<pallas_src>
import functools

import jax
import jax.numpy as jnp
from jax import lax
from jax.experimental import pallas as pl
from jax.experimental.pallas import tpu as pltpu


# ----------------------------------------------------------------------------
# Pallas kernel: full residual block on a (B_TILE, C, L) batch tile.
# ----------------------------------------------------------------------------
def _resblock_kernel(x_ref, a1_ref, c1_ref, w1_ref, cb1_ref,
                     a2_ref, c2_ref, w2_ref, cb2_ref,
                     wd_ref, db_ref, out_ref, hp_ref,
                     *, kernelsize, stride, padding, dilation, l_out):
    x = x_ref[...].astype(jnp.float32)                      # (B, C_in, L)
    B, C_in, L = x.shape

    def channel_mix(w, h):
        # (O, C) x (B, C, L) -> (B, O, L) as a batched MXU matmul (no transposes).
        wb = jnp.broadcast_to(w, (h.shape[0],) + w.shape)
        return lax.dot_general(wb, h, (((2,), (1,)), ((0,), (0,))),
                               preferred_element_type=jnp.float32)

    # --- bn1 (hoisted batch stats folded to scale/shift) + relu --------------
    h = jnp.maximum(a1_ref[...] * x + c1_ref[...], 0.0)
    # --- conv1: kernel_size=1  ==  channel-mixing matmul ----------------------
    h = channel_mix(w1_ref[...], h) + cb1_ref[...]
    # --- bn2 + relu ------------------------------------------------------------
    h = jnp.maximum(a2_ref[...] * h + c2_ref[...], 0.0)

    # --- conv2: zero-haloed VMEM scratch + K shifted slices, fused matmul -----
    if padding > 0:
        zpad = jnp.zeros((B, C_in, padding), jnp.float32)
        hp_ref[:, :, pl.ds(0, padding)] = zpad               # left halo
        hp_ref[:, :, pl.ds(padding + L, padding)] = zpad     # right halo
    hp_ref[:, :, pl.ds(padding, L)] = h

    taps = []
    for k in range(kernelsize):                              # K is small, static
        start = k * dilation
        if stride == 1:
            taps.append(hp_ref[:, :, pl.ds(start, l_out)])
        else:
            taps.append(hp_ref[:, :, pl.ds(start, l_out, stride)])
    stacked = jnp.concatenate(taps, axis=1)                  # (B, K*C_in, L_out)
    out2 = channel_mix(w2_ref[...], stacked) + cb2_ref[...]  # (B, C_out, L_out)

    # --- downsample (1x1 conv on raw x) + residual combine --------------------
    res = channel_mix(wd_ref[...], x) + db_ref[...]          # (B, C_out, L)
    out_ref[...] = res + 0.3 * out2


# ----------------------------------------------------------------------------
# JAX wrapper: hoisted BN stats, weight prep, batch-axis grid.
# ----------------------------------------------------------------------------
@functools.partial(jax.jit,
                   static_argnames=("kernelsize", "stride", "padding",
                                    "dilation", "block_batch"))
def residual_block_encoder(x, params, *, kernelsize, stride, padding, dilation,
                           block_batch=2):
    """x: (N, C_in, L) float32 in PyTorch NCL layout."""
    N, C_in, L = x.shape
    C_out = params["conv2_w"].shape[0]
    K = kernelsize
    L_out = (L + 2 * padding - dilation * (K - 1) - 1) // stride + 1
    if L_out != L:
        raise ValueError(
            "downsample is a 1x1 stride-1 Conv1d, so the residual add requires "
            f"L_out == L (got L={L}, L_out={L_out})")
    eps = jnp.float32(1e-5)
    x = x.astype(jnp.float32)

    # ---- hoisted training-mode BatchNorm batch statistics (biased variance) --
    # bn1 stats come from x directly; bn2 stats need conv1(relu(bn1(x))), a
    # cheap XLA elementwise pass + tiny matmul.  Only the per-channel scalars
    # are hoisted; the fused kernel recomputes the activations per tile.
    m1 = jnp.mean(x, axis=(0, 2))
    v1 = jnp.mean(x * x, axis=(0, 2)) - m1 * m1
    a1 = params["bn1_g"] * lax.rsqrt(v1 + eps)
    c1 = params["bn1_b"] - m1 * a1

    w1 = params["conv1_w"][:, :, 0]                          # (C_in, C_in)
    r = jnp.maximum(a1[None, :, None] * x + c1[None, :, None], 0.0)
    pre2 = jnp.einsum("oi,nil->nol", w1, r) + params["conv1_b"][None, :, None]
    m2 = jnp.mean(pre2, axis=(0, 2))
    v2 = jnp.mean(pre2 * pre2, axis=(0, 2)) - m2 * m2
    a2 = params["bn2_g"] * lax.rsqrt(v2 + eps)
    c2 = params["bn2_b"] - m2 * a2

    # ---- weight prep: stack conv2 taps along the contraction axis ------------
    # w2f[o, k*C_in + c] = conv2_w[o, c, k]  (matches the in-kernel tap stacking)
    w2f = jnp.transpose(params["conv2_w"], (0, 2, 1)).reshape(C_out, K * C_in)
    wd = params["down_w"][:, :, 0]                           # (C_out, C_in)
    col = lambda v: v.reshape(-1, 1).astype(jnp.float32)

    # ---- batch-axis grid (pad N to a multiple of the batch tile) -------------
    bt = min(block_batch, N)
    n_pad = pl.cdiv(N, bt) * bt
    if n_pad != N:
        x_p = jnp.concatenate(
            [x, jnp.zeros((n_pad - N, C_in, L), jnp.float32)], axis=0)
    else:
        x_p = x

    args = (x_p,
            col(a1), col(c1), w1, col(params["conv1_b"]),
            col(a2), col(c2), w2f, col(params["conv2_b"]),
            wd, col(params["down_b"]))

    # Small params: full block + constant index_map -> stay resident in VMEM.
    resident = lambda a: pl.BlockSpec(a.shape, lambda i: (0,) * a.ndim)
    in_specs = ([pl.BlockSpec((bt, C_in, L), lambda i: (i, 0, 0))]
                + [resident(a) for a in args[1:]])
    out_specs = pl.BlockSpec((bt, C_out, L_out), lambda i: (i, 0, 0))

    kernel = functools.partial(_resblock_kernel, kernelsize=K, stride=stride,
                               padding=padding, dilation=dilation, l_out=L_out)
    out = pl.pallas_call(
        kernel,
        out_shape=jax.ShapeDtypeStruct((n_pad, C_out, L_out), jnp.float32),
        grid_spec=pltpu.PrefetchScalarGridSpec(
            num_scalar_prefetch=0,
            grid=(n_pad // bt,),
            in_specs=in_specs,
            out_specs=out_specs,
            scratch_shapes=[
                pltpu.VMEM((bt, C_in, L + 2 * padding), jnp.float32)]),
        compiler_params=pltpu.CompilerParams(
            dimension_semantics=("parallel",)),
    )(*args)
    return out[:N]


# ----------------------------------------------------------------------------
# Pure-JAX reference (lax.conv) for a correctness check.
# ----------------------------------------------------------------------------
def _reference(x, params, *, kernelsize, stride, padding, dilation):
    dn = ("NCH", "OIH", "NCH")

    def bn(h, g, b):
        m = h.mean(axis=(0, 2), keepdims=True)
        v = ((h - m) ** 2).mean(axis=(0, 2), keepdims=True)
        return g[None, :, None] * (h - m) / jnp.sqrt(v + 1e-5) + b[None, :, None]

    h = jax.nn.relu(bn(x, params["bn1_g"], params["bn1_b"]))
    h = lax.conv_general_dilated(h, params["conv1_w"], (1,), [(0, 0)],
                                 dimension_numbers=dn) + params["conv1_b"][None, :, None]
    h = jax.nn.relu(bn(h, params["bn2_g"], params["bn2_b"]))
    out = lax.conv_general_dilated(h, params["conv2_w"], (stride,), [(padding, padding)],
                                   rhs_dilation=(dilation,),
                                   dimension_numbers=dn) + params["conv2_b"][None, :, None]
    res = lax.conv_general_dilated(x, params["down_w"], (1,), [(0, 0)],
                                   dimension_numbers=dn) + params["down_b"][None, :, None]
    return res + 0.3 * out


# ----------------------------------------------------------------------------
if __name__ == "__main__":
    # Module config (downsample instantiated as a 1x1 Conv1d).
    N, C_in, C_out, L = 4, 8, 16, 32
    kernelsize, stride, padding, dilation = 3, 1, 1, 1

    key = jax.random.PRNGKey(0)
    ks = jax.random.split(key, 9)
    params = {
        "bn1_g": 1.0 + 0.1 * jax.random.normal(ks[0], (C_in,), jnp.float32),
        "bn1_b": 0.1 * jax.random.normal(ks[1], (C_in,), jnp.float32),
        "conv1_w": 0.2 * jax.random.normal(ks[2], (C_in, C_in, 1), jnp.float32),
        "conv1_b": 0.1 * jax.random.normal(ks[3], (C_in,), jnp.float32),
        "bn2_g": 1.0 + 0.1 * jax.random.normal(ks[4], (C_in,), jnp.float32),
        "bn2_b": 0.1 * jax.random.normal(ks[5], (C_in,), jnp.float32),
        "conv2_w": 0.2 * jax.random.normal(ks[6], (C_out, C_in, kernelsize), jnp.float32),
        "conv2_b": 0.1 * jax.random.normal(ks[7], (C_out,), jnp.float32),
        "down_w": 0.2 * jax.random.normal(ks[8], (C_out, C_in, 1), jnp.float32),
        "down_b": jnp.zeros((C_out,), jnp.float32),
    }

    x = jax.random.normal(jax.random.PRNGKey(1), (N, C_in, L), jnp.float32)

    y = residual_block_encoder(x, params, kernelsize=kernelsize, stride=stride,
                               padding=padding, dilation=dilation, block_batch=2)
    y = jax.block_until_ready(y)

    y_ref = _reference(x, params, kernelsize=kernelsize, stride=stride,
                       padding=padding, dilation=dilation)
    assert y.shape == y_ref.shape == (N, C_out, L)
    assert jnp.allclose(y, y_ref, atol=1e-4, rtol=1e-4), float(jnp.abs(y - y_ref).max())

    print("KERNEL_OK")
</pallas_src>

<mosaic_0001>
module attributes {stable_mosaic.version = 11 : i64} {
  func.func @_resblock_kernel(%arg0: i32, %arg1: memref<2x8x32xf32, #tpu.memory_space<vmem>>, %arg2: memref<8x1xf32, #tpu.memory_space<vmem>>, %arg3: memref<8x1xf32, #tpu.memory_space<vmem>>, %arg4: memref<8x8xf32, #tpu.memory_space<vmem>>, %arg5: memref<8x1xf32, #tpu.memory_space<vmem>>, %arg6: memref<8x1xf32, #tpu.memory_space<vmem>>, %arg7: memref<8x1xf32, #tpu.memory_space<vmem>>, %arg8: memref<16x24xf32, #tpu.memory_space<vmem>>, %arg9: memref<16x1xf32, #tpu.memory_space<vmem>>, %arg10: memref<16x8xf32, #tpu.memory_space<vmem>>, %arg11: memref<16x1xf32, #tpu.memory_space<vmem>>, %arg12: memref<2x16x32xf32, #tpu.memory_space<vmem>>, %arg13: memref<2x8x34xf32, #tpu.memory_space<vmem>>) attributes {dimension_semantics = [#tpu.dimension_semantics<parallel>], iteration_bounds = array<i64: 2>, scalar_prefetch = 0 : i64, scratch_operands = 1 : i64, tpu.core_type = #tpu.core_type<tc>, window_params = [{transform_indices = @transform_0, window_bounds = array<i64: 2, 8, 32>}, {pipeline_mode = #tpu.pipeline_mode<synchronous>, transform_indices = @transform_1, window_bounds = array<i64: 8, 1>}, {pipeline_mode = #tpu.pipeline_mode<synchronous>, transform_indices = @transform_2, window_bounds = array<i64: 8, 1>}, {pipeline_mode = #tpu.pipeline_mode<synchronous>, transform_indices = @transform_3, window_bounds = array<i64: 8, 8>}, {pipeline_mode = #tpu.pipeline_mode<synchronous>, transform_indices = @transform_4, window_bounds = array<i64: 8, 1>}, {pipeline_mode = #tpu.pipeline_mode<synchronous>, transform_indices = @transform_5, window_bounds = array<i64: 8, 1>}, {pipeline_mode = #tpu.pipeline_mode<synchronous>, transform_indices = @transform_6, window_bounds = array<i64: 8, 1>}, {pipeline_mode = #tpu.pipeline_mode<synchronous>, transform_indices = @transform_7, window_bounds = array<i64: 16, 24>}, {pipeline_mode = #tpu.pipeline_mode<synchronous>, transform_indices = @transform_8, window_bounds = array<i64: 16, 1>}, {pipeline_mode = #tpu.pipeline_mode<synchronous>, transform_indices = @transform_9, window_bounds = array<i64: 16, 8>}, {pipeline_mode = #tpu.pipeline_mode<synchronous>, transform_indices = @transform_10, window_bounds = array<i64: 16, 1>}, {transform_indices = @transform_11, window_bounds = array<i64: 2, 16, 32>}]} {
    %c0 = arith.constant 0 : index
    %c0_0 = arith.constant 0 : index
    %c0_1 = arith.constant 0 : index
    %0 = vector.load %arg1[%c0, %c0_0, %c0_1] : memref<2x8x32xf32, #tpu.memory_space<vmem>>, vector<2x8x32xf32>
    %c0_2 = arith.constant 0 : index
    %c0_3 = arith.constant 0 : index
    %1 = vector.load %arg2[%c0_2, %c0_3] : memref<8x1xf32, #tpu.memory_space<vmem>>, vector<8x1xf32>
    %2 = vector.shape_cast %1 : vector<8x1xf32> to vector<1x8x1xf32>
    %3 = vector.broadcast %2 : vector<1x8x1xf32> to vector<2x8x32xf32>
    %4 = arith.mulf %3, %0 : vector<2x8x32xf32>
    %c0_4 = arith.constant 0 : index
    %c0_5 = arith.constant 0 : index
    %5 = vector.load %arg3[%c0_4, %c0_5] : memref<8x1xf32, #tpu.memory_space<vmem>>, vector<8x1xf32>
    %6 = vector.shape_cast %5 : vector<8x1xf32> to vector<1x8x1xf32>
    %7 = vector.broadcast %6 : vector<1x8x1xf32> to vector<2x8x32xf32>
    %8 = arith.addf %4, %7 : vector<2x8x32xf32>
    %cst = arith.constant 0.000000e+00 : f32
    %9 = vector.broadcast %cst : f32 to vector<2x8x32xf32>
    %10 = arith.maximumf %8, %9 : vector<2x8x32xf32>
    %c0_6 = arith.constant 0 : index
    %c0_7 = arith.constant 0 : index
    %11 = vector.load %arg4[%c0_6, %c0_7] : memref<8x8xf32, #tpu.memory_space<vmem>>, vector<8x8xf32>
    %12 = vector.shape_cast %11 : vector<8x8xf32> to vector<1x8x8xf32>
    %13 = vector.broadcast %12 : vector<1x8x8xf32> to vector<2x8x8xf32>
    %cst_8 = arith.constant dense<0.000000e+00> : vector<2x8x32xf32>
    %14 = tpu.matmul %13, %10, %cst_8 {dimension_numbers = #tpu.dot_dimension_numbers<[2], [1], [1], [2], [0, 0, 0, 1, 1, 2], [0], [0]>} : vector<2x8x8xf32>, vector<2x8x32xf32>, vector<2x8x32xf32> -> vector<2x8x32xf32>
    %c0_9 = arith.constant 0 : index
    %c0_10 = arith.constant 0 : index
    %15 = vector.load %arg5[%c0_9, %c0_10] : memref<8x1xf32, #tpu.memory_space<vmem>>, vector<8x1xf32>
    %16 = vector.shape_cast %15 : vector<8x1xf32> to vector<1x8x1xf32>
    %17 = vector.broadcast %16 : vector<1x8x1xf32> to vector<2x8x32xf32>
    %18 = arith.addf %14, %17 : vector<2x8x32xf32>
    %c0_11 = arith.constant 0 : index
    %c0_12 = arith.constant 0 : index
    %19 = vector.load %arg6[%c0_11, %c0_12] : memref<8x1xf32, #tpu.memory_space<vmem>>, vector<8x1xf32>
    %20 = vector.shape_cast %19 : vector<8x1xf32> to vector<1x8x1xf32>
    %21 = vector.broadcast %20 : vector<1x8x1xf32> to vector<2x8x32xf32>
    %22 = arith.mulf %21, %18 : vector<2x8x32xf32>
    %c0_13 = arith.constant 0 : index
    %c0_14 = arith.constant 0 : index
    %23 = vector.load %arg7[%c0_13, %c0_14] : memref<8x1xf32, #tpu.memory_space<vmem>>, vector<8x1xf32>
    %24 = vector.shape_cast %23 : vector<8x1xf32> to vector<1x8x1xf32>
    %25 = vector.broadcast %24 : vector<1x8x1xf32> to vector<2x8x32xf32>
    %26 = arith.addf %22, %25 : vector<2x8x32xf32>
    %cst_15 = arith.constant 0.000000e+00 : f32
    %27 = vector.broadcast %cst_15 : f32 to vector<2x8x32xf32>
    %28 = arith.maximumf %26, %27 : vector<2x8x32xf32>
    %cst_16 = arith.constant 0.000000e+00 : f32
    %29 = vector.broadcast %cst_16 : f32 to vector<2x8x1xf32>
    %c0_17 = arith.constant 0 : index
    %c0_18 = arith.constant 0 : index
    %c0_19 = arith.constant 0 : index
    %30 = vector.load %arg13[%c0_17, %c0_18, %c0_19] : memref<2x8x34xf32, #tpu.memory_space<vmem>>, vector<2x8x1xf32>
    tpu.vector_store %arg13[%c0_17, %c0_18, %c0_19], %29 {strides = array<i32>} : memref<2x8x34xf32, #tpu.memory_space<vmem>>, vector<2x8x1xf32>,
    %c0_20 = arith.constant 0 : index
    %c0_21 = arith.constant 0 : index
    %c33 = arith.constant 33 : index
    %31 = vector.load %arg13[%c0_20, %c0_21, %c33] : memref<2x8x34xf32, #tpu.memory_space<vmem>>, vector<2x8x1xf32>
    tpu.vector_store %arg13[%c0_20, %c0_21, %c33], %29 {strides = array<i32>} : memref<2x8x34xf32, #tpu.memory_space<vmem>>, vector<2x8x1xf32>,
    %c0_22 = arith.constant 0 : index
    %c0_23 = arith.constant 0 : index
    %c1 = arith.constant 1 : index
    %32 = vector.load %arg13[%c0_22, %c0_23, %c1] : memref<2x8x34xf32, #tpu.memory_space<vmem>>, vector<2x8x32xf32>
    tpu.vector_store %arg13[%c0_22, %c0_23, %c1], %28 {strides = array<i32>} : memref<2x8x34xf32, #tpu.memory_space<vmem>>, vector<2x8x32xf32>,
    %c0_24 = arith.constant 0 : index
    %c0_25 = arith.constant 0 : index
    %c0_26 = arith.constant 0 : index
    %33 = vector.load %arg13[%c0_24, %c0_25, %c0_26] : memref<2x8x34xf32, #tpu.memory_space<vmem>>, vector<2x8x32xf32>
    %c0_27 = arith.constant 0 : index
    %c0_28 = arith.constant 0 : index
    %c1_29 = arith.constant 1 : index
    %34 = vector.load %arg13[%c0_27, %c0_28, %c1_29] : memref<2x8x34xf32, #tpu.memory_space<vmem>>, vector<2x8x32xf32>
    %c0_30 = arith.constant 0 : index
    %c0_31 = arith.constant 0 : index
    %c2 = arith.constant 2 : index
    %35 = vector.load %arg13[%c0_30, %c0_31, %c2] : memref<2x8x34xf32, #tpu.memory_space<vmem>>, vector<2x8x32xf32>
    %36 = tpu.concatenate %33, %34, %35 in 1 : vector<2x8x32xf32>, vector<2x8x32xf32>, vector<2x8x32xf32> -> vector<2x24x32xf32>
    %c0_32 = arith.constant 0 : index
    %c0_33 = arith.constant 0 : index
    %37 = vector.load %arg8[%c0_32, %c0_33] : memref<16x24xf32, #tpu.memory_space<vmem>>, vector<16x24xf32>
    %38 = vector.shape_cast %37 : vector<16x24xf32> to vector<1x16x24xf32>
    %39 = vector.broadcast %38 : vector<1x16x24xf32> to vector<2x16x24xf32>
    %cst_34 = arith.constant dense<0.000000e+00> : vector<2x16x32xf32>
    %40 = tpu.matmul %39, %36, %cst_34 {dimension_numbers = #tpu.dot_dimension_numbers<[2], [1], [1], [2], [0, 0, 0, 1, 1, 2], [0], [0]>} : vector<2x16x24xf32>, vector<2x24x32xf32>, vector<2x16x32xf32> -> vector<2x16x32xf32>
    %c0_35 = arith.constant 0 : index
    %c0_36 = arith.constant 0 : index
    %41 = vector.load %arg9[%c0_35, %c0_36] : memref<16x1xf32, #tpu.memory_space<vmem>>, vector<16x1xf32>
    %42 = vector.shape_cast %41 : vector<16x1xf32> to vector<1x16x1xf32>
    %43 = vector.broadcast %42 : vector<1x16x1xf32> to vector<2x16x32xf32>
    %44 = arith.addf %40, %43 : vector<2x16x32xf32>
    %c0_37 = arith.constant 0 : index
    %c0_38 = arith.constant 0 : index
    %45 = vector.load %arg10[%c0_37, %c0_38] : memref<16x8xf32, #tpu.memory_space<vmem>>, vector<16x8xf32>
    %46 = vector.shape_cast %45 : vector<16x8xf32> to vector<1x16x8xf32>
    %47 = vector.broadcast %46 : vector<1x16x8xf32> to vector<2x16x8xf32>
    %cst_39 = arith.constant dense<0.000000e+00> : vector<2x16x32xf32>
    %48 = tpu.matmul %47, %0, %cst_39 {dimension_numbers = #tpu.dot_dimension_numbers<[2], [1], [1], [2], [0, 0, 0, 1, 1, 2], [0], [0]>} : vector<2x16x8xf32>, vector<2x8x32xf32>, vector<2x16x32xf32> -> vector<2x16x32xf32>
    %c0_40 = arith.constant 0 : index
    %c0_41 = arith.constant 0 : index
    %49 = vector.load %arg11[%c0_40, %c0_41] : memref<16x1xf32, #tpu.memory_space<vmem>>, vector<16x1xf32>
    %50 = vector.shape_cast %49 : vector<16x1xf32> to vector<1x16x1xf32>
    %51 = vector.broadcast %50 : vector<1x16x1xf32> to vector<2x16x32xf32>
    %52 = arith.addf %48, %51 : vector<2x16x32xf32>
    %cst_42 = arith.constant 3.000000e-01 : f32
    %53 = vector.broadcast %cst_42 : f32 to vector<2x16x32xf32>
    %54 = arith.mulf %53, %44 : vector<2x16x32xf32>
    %55 = arith.addf %52, %54 : vector<2x16x32xf32>
    %c0_43 = arith.constant 0 : index
    %c0_44 = arith.constant 0 : index
    %c0_45 = arith.constant 0 : index
    %56 = vector.load %arg12[%c0_43, %c0_44, %c0_45] : memref<2x16x32xf32, #tpu.memory_space<vmem>>, vector<2x16x32xf32>
    tpu.vector_store %arg12[%c0_43, %c0_44, %c0_45], %55 {strides = array<i32>} : memref<2x16x32xf32, #tpu.memory_space<vmem>>, vector<2x16x32xf32>,
    return
  }
  func.func @transform_0(%arg0: i32) -> (i32, i32, i32) {
    %c0_i32 = arith.constant 0 : i32
    %c0_i32_0 = arith.constant 0 : i32
    %c0_i32_1 = arith.constant 0 : i32
    return %arg0, %c0_i32, %c0_i32_0 : i32, i32, i32
  }
  func.func @transform_1(%arg0: i32) -> (i32, i32) {
    %c0_i32 = arith.constant 0 : i32
    %c0_i32_0 = arith.constant 0 : i32
    %c0_i32_1 = arith.constant 0 : i32
    return %c0_i32, %c0_i32_0 : i32, i32
  }
  func.func @transform_2(%arg0: i32) -> (i32, i32) {
    %c0_i32 = arith.constant 0 : i32
    %c0_i32_0 = arith.constant 0 : i32
    %c0_i32_1 = arith.constant 0 : i32
    return %c0_i32, %c0_i32_0 : i32, i32
  }
  func.func @transform_3(%arg0: i32) -> (i32, i32) {
    %c0_i32 = arith.constant 0 : i32
    %c0_i32_0 = arith.constant 0 : i32
    %c0_i32_1 = arith.constant 0 : i32
    return %c0_i32, %c0_i32_0 : i32, i32
  }
  func.func @transform_4(%arg0: i32) -> (i32, i32) {
    %c0_i32 = arith.constant 0 : i32
    %c0_i32_0 = arith.constant 0 : i32
    %c0_i32_1 = arith.constant 0 : i32
    return %c0_i32, %c0_i32_0 : i32, i32
  }
  func.func @transform_5(%arg0: i32) -> (i32, i32) {
    %c0_i32 = arith.constant 0 : i32
    %c0_i32_0 = arith.constant 0 : i32
    %c0_i32_1 = arith.constant 0 : i32
    return %c0_i32, %c0_i32_0 : i32, i32
  }
  func.func @transform_6(%arg0: i32) -> (i32, i32) {
    %c0_i32 = arith.constant 0 : i32
    %c0_i32_0 = arith.constant 0 : i32
    %c0_i32_1 = arith.constant 0 : i32
    return %c0_i32, %c0_i32_0 : i32, i32
  }
  func.func @transform_7(%arg0: i32) -> (i32, i32) {
    %c0_i32 = arith.constant 0 : i32
    %c0_i32_0 = arith.constant 0 : i32
    %c0_i32_1 = arith.constant 0 : i32
    return %c0_i32, %c0_i32_0 : i32, i32
  }
  func.func @transform_8(%arg0: i32) -> (i32, i32) {
    %c0_i32 = arith.constant 0 : i32
    %c0_i32_0 = arith.constant 0 : i32
    %c0_i32_1 = arith.constant 0 : i32
    return %c0_i32, %c0_i32_0 : i32, i32
  }
  func.func @transform_9(%arg0: i32) -> (i32, i32) {
    %c0_i32 = arith.constant 0 : i32
    %c0_i32_0 = arith.constant 0 : i32
    %c0_i32_1 = arith.constant 0 : i32
    return %c0_i32, %c0_i32_0 : i32, i32
  }
  func.func @transform_10(%arg0: i32) -> (i32, i32) {
    %c0_i32 = arith.constant 0 : i32
    %c0_i32_0 = arith.constant 0 : i32
    %c0_i32_1 = arith.constant 0 : i32
    return %c0_i32, %c0_i32_0 : i32, i32
  }
  func.func @transform_11(%arg0: i32) -> (i32, i32, i32) {
    %c0_i32 = arith.constant 0 : i32
    %c0_i32_0 = arith.constant 0 : i32
    %c0_i32_1 = arith.constant 0 : i32
    return %arg0, %c0_i32, %c0_i32_0 : i32, i32, i32
  }
}

</mosaic_0001>

<bundles_post_ra>
// kernel: residual_block_encoder.1
= control target key start
LH: loop header
LB: loop body
LE: loop exit
PB: predicated region body
PF: predicated region fallthrough
CT: control target
= control target key end

     0   :  { %s1084_s0 = inlined_call_operand.vmem [shape: f32[4,8,32], index: 0, kind: input, shape index: {}]   ;;  %s1085_s1 = inlined_call_operand.vmem [shape: f32[8,1], index: 1, kind: input, shape index: {}]   ;;  %s1086_s2 = inlined_call_operand.vmem [shape: f32[8,1], index: 2, kind: input, shape index: {}]   ;;  %s1087_s3 = inlined_call_operand.vmem [shape: f32[8,8], index: 3, kind: input, shape index: {}]   ;;  %s1088_s4 = inlined_call_operand.vmem [shape: f32[8,1], index: 4, kind: input, shape index: {}]   ;;  %s1089_s5 = inlined_call_operand.vmem [shape: f32[8,1], index: 5, kind: input, shape index: {}]   ;;  %s1090_s6 = inlined_call_operand.vmem [shape: f32[8,1], index: 6, kind: input, shape index: {}]   ;;  %s1091_s7 = inlined_call_operand.vmem [shape: f32[16,24], index: 7, kind: input, shape index: {}]   ;;  %s1092_s8 = inlined_call_operand.vmem [shape: f32[16,1], index: 8, kind: input, shape index: {}]   ;;  %s1093_s9 = inlined_call_operand.vmem [shape: f32[16,8], index: 9, kind: input, shape index: {}]   ;;  %s1094_s10 = inlined_call_operand.vmem [shape: f32[16,1], index: 10, kind: input, shape index: {}]   ;;  %s1095_s11 = inlined_call_operand.hbm [shape: f32[4,16,32], index: 11, kind: output, shape index: {}]  }
   0x1   :  { %1096 = sst [smem:[#allocation6_spill]] %s1084_s0 }
   0x2   :  { %16 = vsyncpa [#allocation4], 0 }
   0x3   :  { %18 = vsyncpa [#allocation4 + $0x1], 0  ;;  %s950_s17 = smov 0   ;;  %s952_s18 = smov 0  }
   0x4   :  { %s954_s19 = smov 0   ;;  %s956_s20 = smov 0  }
   0x5 LB: > { %s971_s21 = sadd.s32 4294967295, %s881_s20   ;;  %s735_s22 = sadd.s32 4294967294, %s881_s20   ;;  %s881_s20 = sphi %s956_s20, %s1103_s20   ;;  %s877_s19 = sphi %s954_s19, %s1102_s19   ;;  %s873_s18 = sphi %s952_s18, %s1101_s18   ;;  %s869_s17 = sphi %s950_s17, %s1100_s17  }
   0x6   : > { %s975_s23 = sadd.s32 1, %s881_s20   ;;  %s267_s24 = sadd.s32 1, %s877_s19 }
   0x7   : > { %s264_s25 = ssub.s32 %s881_s20, %s975_s23  ;;  %p277_p0 = scmp.ne.s32.totalorder %s877_s19, %s873_s18 }
   0x8   : > { %p265_p1 = scmp.eq.s32.totalorder %s264_s25, 0  ;;  %p278_p2 = scmp.eq.s32.totalorder %s971_s21, 1 }
   0x9   : > { %p283_p3 = scmp.ne.s32.totalorder %s873_s18, %s869_s17  ;;  %p284_p4 = scmp.eq.s32.totalorder %s735_s22, 1 }
   0xa   : > { %s986_s26 = scalar_select %p265_p1, %s877_s19, %s267_s24  }
   0xb   : > { %p988_p5 = por %p278_p2, %p277_p0  ;;  %p992_p6 = por %p284_p4, %p283_p3 }
   0xc   : > { %p738_p7 = scmp.ge.s32.totalorder %s881_s20, 1  ;;  %p341_p8 = scmp.lt.s32.totalorder %s881_s20, 3 }
   0xe   : > { %p342_p9 = pnand %p738_p7, %p341_p8 }
   0xf   : > { %s740_s29 = sshll.u32 (!%p342_p9), %s971_s21, 1  ;;  %s1099_s0 = sld [smem:[#allocation6_spill]] (!%p342_p9) }
  0x10   : > { %345 = sbr.rel (%p342_p9) target bundleno = 683 (0x2ab), region = 64  ;;  %p382_p10 = scmp.lt.s32.totalorder (!%p342_p9), %s740_s29, 3 }
  0x11   : > { %s886_s16 = smov (!%p342_p9), 127   ;;  %s887_s22 = smov (!%p342_p9), 126  }
  0x12   : > { %s759_s24 = sshll.u32 (!%p342_p9), %s971_s21, 5 }
  0x13   : > { %s669_s12 = scalar_lea.hbm (!%p342_p9), %s1095_s11, %s759_s24 }
  0x14   : > { %s672_s13 = sshll.u32 (!%p342_p9), %s669_s12, 4  ;;  %s673_s13 = int_to_ptr.hbm [resolvable:$true] %s672_s13 }
  0x15   : > { %v390_v0 = vld [vmem:[%s1085_s1] sm:$0xff]  ;;  %v883_v1 = vmov 0   ;;  %s1105_s29 = smov (!%p382_p10, %s740_s29), 3  ;;  %vm415_vm0 = vcmask 64512   ;;  %v578_v18 = vld [vmem:[%s1093_s9 + $0x8] sm:$0xff]  ;;  %vm477_vm1 = vcmask 7168  }
  0x16   : > { %806 = vset.pattern.permute.xlu0 %v883_v1  ;;  %807 = vset.pattern.permute.xlu1 %v883_v1  ;;  %v398_v2 = vld [vmem:[%s1086_s2] sm:$0xff]  ;;  %s741_s30 = sshll.u32 %s1105_s29, 3  ;;  %vm480_vm2 = vcmask 277768   ;;  %v884_v20 = vmov 0.0   ;;  %v580_v34 = vld [vmem:[%s1094_s10 + $0x8] sm:$0xff]  ;;  %vm491_vm3 = vcmask 269320  }
  0x17   : > { %393 = vperm.xlu0 %806, %v390_v0   ;;  %808 = vset.pattern.permute.xlu2 %v883_v1  ;;  %v409_v3 = vld [vmem:[%s1088_s4] sm:$0xff]  ;;  %s385_s14 = scalar_lea.vmem %s1099_s0, %s741_s30  ;;  %478 = vst.msk [vmem:[#allocation2] sm:$0xff] %vm477_vm1, %v884_v20  ;;  %s885_s30 = smov 1   ;;  %v513_v41 = vld [vmem:[%s1092_s8 + $0x8] sm:$0xff]  ;;  %vm524_vm4 = vcmask 195584   ;;  %vm651_vm5 = vcmask 261120  }
  0x18   : > { %412 = vperm.xlu1 %807, %v409_v3   ;;  %v459_v4 = vld [vmem:[%s1089_s5] sm:$0xff]  ;;  %v389_v8 = vld [vmem:[%s385_s14 + $0x8] sm:$0xff]  ;;  %481 = vst.msk [vmem:[#allocation2] sm:$0xff] %vm480_vm2, %v884_v20  ;;  %s833_s15 = sshra.s32 %s673_s13, 4  ;;  %s834_s15 = int_to_ptr.hbm [resolvable:$true] %s833_s15 }
  0x19   : > { %v467_v5 = vld [vmem:[%s1090_s6] sm:$0xff]  ;;  %479 = vst.msk [vmem:[#allocation2 + $0x8] sm:$0xff] %vm477_vm1, %v884_v20  ;;  %v511_v49 = vld [vmem:[%s1091_s7 + $0x8] sm:$0xff]  ;;  %p840_p0 = scmp.lt.s32.totalorder %s834_s15, %s1095_s11 }
  0x1a   : > { %470 = vperm.xlu2 %808, %v467_v5   ;;  %v388_v7 = vld [vmem:[%s385_s14] sm:$0xff]  ;;  %482 = vst.msk [vmem:[#allocation2 + $0x8] sm:$0xff] %vm480_vm2, %v884_v20 }
  0x1b   : > { %v408_v16 = vld [vmem:[%s1087_s3] sm:$0xff] }
  0x1c   : > { %v577_v17 = vld [vmem:[%s1093_s9] sm:$0xff] }
  0x1d   : > { %v512_v33 = vld [vmem:[%s1092_s8] sm:$0xff] }
  0x1e   : > { %v579_v40 = vld [vmem:[%s1094_s10] sm:$0xff] }
  0x1f   : > { %401 = vperm.xlu0 %806, %v398_v2   ;;  %v510_v48 = vld [vmem:[%s1091_s7] sm:$0xff] }
  0x20   : > { %462 = vperm.xlu1 %807, %v459_v4  }
  0x74   : > { %v471_v26 = vpop.permute.xlu2 %470 }
  0x89   : > { %v394_v6 = vpop.permute.xlu0 %393 }
  0x8a   : > { %v396_v9 = vmul.f32 %v394_v6, %v388_v7  ;;  %v397_v10 = vmul.f32 %v394_v6, %v389_v8  ;;  %v413_v19 = vpop.permute.xlu1 %412 }
  0x91   : > { %v402_v11 = vpop.permute.xlu0 %401 }
  0x92   : > { %v404_v12 = vadd.f32 %v402_v11, %v396_v9  ;;  %v405_v13 = vadd.f32 %v402_v11, %v397_v10  ;;  %v463_v25 = vpop.permute.xlu1 %462 }
  0x94   : > { %v406_v14 = vmax.f32 %v404_v12, 0.0  ;;  %v407_v15 = vmax.f32 %v405_v13, 0.0 }
  0x96   : > { %434 = vmatpush.msra.mxu0 %v406_v14  ;;  %454 = vmatpush.msra.mxu1 %v407_v15 }
  0x97   : > { %742 = vmatmul.msk.f32.vlgmr.msra.gmra.mxu0 %vm415_vm0, %v408_v16  ;;  %743 = vmatmul.msk.f32.vlgmr.msra.gmra.mxu1 %vm415_vm0, %v408_v16 }
  0x98   : > { %612 = vmatpush.msrb.mxu0 %v388_v7  ;;  %635 = vmatpush.msrb.mxu1 %v389_v8 }
  0x9f   : > { %748 = vmatmul.msk.f32.vlgmr.msrb.gmra.mxu0 %vm415_vm0, %v577_v17  ;;  %750 = vmatmul.msk.f32.vlgmr.msrb.gmra.mxu1 %vm415_vm0, %v577_v17 }
  0xa7   : > { %749 = vmatmul.msk.f32.gmra.mxu0 %vm415_vm0, %v578_v18  ;;  %751 = vmatmul.msk.f32.gmra.mxu1 %vm415_vm0, %v578_v18 }
 0x114   : > { %v436_v21 = vpop.f32.mrf.mxu0  ;;  %v456_v22 = vpop.f32.mrf.mxu1 }
 0x115   : > { %v437_v23 = vadd.f32 %v436_v21, %v413_v19  ;;  %v457_v24 = vadd.f32 %v456_v22, %v413_v19 }
 0x117   : > { %v465_v27 = vmul.f32 %v463_v25, %v437_v23  ;;  %v466_v28 = vmul.f32 %v463_v25, %v457_v24 }
 0x119   : > { %v473_v29 = vadd.f32 %v471_v26, %v465_v27  ;;  %v474_v30 = vadd.f32 %v471_v26, %v466_v28 }
 0x11b   : > { %v475_v31 = vmax.f32 %v473_v29, 0.0  ;;  %v476_v32 = vmax.f32 %v474_v30, 0.0 }
 0x11c   : > { %v637_v50 = vpop.f32.mrf.mxu1  ;;  %v614_v51 = vpop.f32.mrf.mxu0 }
 0x11d   : > { %487 = vrot.lane.b32.xlu0 %v476_v32, %s885_s30  ;;  %485 = vrot.lane.b32.xlu2 %v475_v31, %s885_s30  ;;  %s839_s30 = scalar_lea.hbm %s1095_s11, 64 }
 0x124   : > { %v640_v0 = vpop.f32.mrf.mxu1  ;;  %v617_v1 = vpop.f32.mrf.mxu0 }
 0x125   : > { %516 = vperm.xlu0 %806, %v512_v33  }
 0x12d   : > { %588 = vperm.xlu0 %806, %v580_v34  }
 0x177   : > { %v486_v35 = vpop.permute.xlu2 %485 }
 0x178   : > { %492 = vst.msk [vmem:[#allocation2] sm:$0xff] %vm491_vm3, %v486_v35 }
 0x17f   : > { %v494_v37 = vld [vmem:[#allocation2] sm:$0xff] }
 0x18f   : > { %v488_v36 = vpop.permute.xlu0 %487 }
 0x190   : > { %493 = vst.msk [vmem:[#allocation2 + $0x8] sm:$0xff] %vm491_vm3, %v488_v36 }
 0x197   : > { %v495_v38 = vld [vmem:[#allocation2 + $0x8] sm:$0xff]  ;;  %v517_v52 = vpop.permute.xlu0 %516 }
 0x198   : > { %v814_v39 = vpack.i.bf16 %v495_v38, %v494_v37 }
 0x19a   : > { %815 = vrot.lane.b32.xlu2 %v814_v39, %s886_s16  ;;  %810 = vrot.lane.b32.xlu1 %v814_v39, %s887_s22  ;;  %s378_s16 = sand.u32 1, %s873_s18  }
 0x19b   : > { %s739_s22 = sshll.u32 %s378_s16, 5  ;;  %s657_s14 = scalar_lea.sflag [#allocation4], %s378_s16 }
 0x19c   : > { %s380_s25 = scalar_lea.vmem [#allocation3], %s739_s22  ;;  %s835_s22 = scalar_lea.hbm %s834_s15, 32 }
 0x19d   : > { %s670_s21 = sshll.u32 %s380_s25, 4  ;;  %p836_p11 = scmp.ne.s32.totalorder %s834_s15, %s835_s22  ;;  %s671_s21 = int_to_ptr.vmem [resolvable:$true] %s670_s21 }
 0x19e   : > { %p841_p1 = scmp.lt.s32.totalorder %s839_s30, %s835_s22 }
 0x19f   : > { %v589_v2 = vpop.permute.xlu0 %588  ;;  %p837_p12 = pnand %p836_p11, %p988_p5 }
 0x1a0   : > { %v641_v8 = vadd.f32 %v640_v0, %v589_v2  ;;  %v618_v9 = vadd.f32 %v617_v1, %v589_v2  ;;  %p842_p2 = por %p841_p1, %p840_p0 }
 0x1a1   : > { %p838_p13 = pneg %p837_p12 }
 0x1a2   : > { %583 = vperm.xlu2 %808, %v579_v40   ;;  %521 = vperm.xlu1 %807, %v513_v41  }
 0x1a3   : > { %p843_p3 = pnand %p842_p2, %p838_p13 }
 0x1f4   : > { %v816_v42 = vpop.permute.xlu2 %815 }
 0x1f5   : > { %v817_v46 = vunpack.i.l.bf16 %v816_v42  ;;  %v818_v47 = vunpack.i.h.bf16 %v816_v42 }
 0x1fc   : > { %v584_v53 = vpop.permute.xlu2 %583 }
 0x1fd   : > { %v615_v58 = vadd.f32 %v614_v51, %v584_v53  ;;  %v638_v59 = vadd.f32 %v637_v50, %v584_v53 }
 0x20c   : > { %v811_v43 = vpop.permute.xlu1 %810 }
 0x20d   : > { %v812_v44 = vunpack.i.l.bf16 %v811_v43  ;;  %v813_v45 = vunpack.i.h.bf16 %v811_v43 }
 0x20f   : > { %544 = vmatpush.msra.mxu2 %v812_v44  ;;  %567 = vmatpush.msra.mxu3 %v813_v45 }
 0x211   : > { %545 = vmatpush.msra.mxu2 %v817_v46  ;;  %568 = vmatpush.msra.mxu3 %v818_v47 }
 0x213   : > { %546 = vmatpush.msra.mxu2 %v494_v37  ;;  %569 = vmatpush.msra.mxu3 %v495_v38 }
 0x214   : > { %744 = vmatmul.msk.f32.vlgmr.msra.gmra.mxu2 %vm524_vm4, %v510_v48  ;;  %746 = vmatmul.msk.f32.vlgmr.msra.gmra.mxu3 %vm524_vm4, %v510_v48  ;;  %v522_v3 = vpop.permute.xlu1 %521 }
 0x21c   : > { %745 = vmatmul.msk.f32.gmra.mxu2 %vm524_vm4, %v511_v49  ;;  %747 = vmatmul.msk.f32.gmra.mxu3 %vm524_vm4, %v511_v49 }
 0x297   : > { %v548_v54 = vpop.f32.mrf.mxu2  ;;  %v571_v55 = vpop.f32.mrf.mxu3 }
 0x298   : > { %v549_v56 = vadd.f32 %v548_v54, %v517_v52  ;;  %v572_v57 = vadd.f32 %v571_v55, %v517_v52 }
 0x29a   : > { %v643_v60 = vmul.f32 0.3, %v549_v56  ;;  %v645_v61 = vmul.f32 0.3, %v572_v57 }
 0x29c   : > { %v647_v62 = vadd.f32 %v643_v60, %v615_v58  ;;  %v649_v63 = vadd.f32 %v645_v61, %v638_v59 }
 0x29e   : > { %652 = vst.msk [vmem:[%s380_s25] sm:$0xff] %vm651_vm5, %v647_v62 }
 0x29f   : > { %654 = vst.msk [vmem:[%s380_s25 + $0x10] sm:$0xff] %vm651_vm5, %v649_v63  ;;  %v551_v4 = vpop.f32.mrf.mxu2  ;;  %v574_v5 = vpop.f32.mrf.mxu3 }
 0x2a0   : > { %v552_v6 = vadd.f32 %v551_v4, %v522_v3  ;;  %v575_v7 = vadd.f32 %v574_v5, %v522_v3 }
 0x2a2   : > { %v644_v10 = vmul.f32 0.3, %v552_v6  ;;  %v646_v11 = vmul.f32 0.3, %v575_v7 }
 0x2a4   : > { %v648_v12 = vadd.f32 %v644_v10, %v618_v9  ;;  %v650_v13 = vadd.f32 %v646_v11, %v641_v8 }
 0x2a6   : > { %653 = vst.msk [vmem:[%s380_s25 + $0x8] sm:$0xff] %vm651_vm5, %v648_v12 }
 0x2a7   : > { %655 = vst.msk [vmem:[%s380_s25 + $0x18] sm:$0xff] %vm651_vm5, %v650_v13 }
 0x2a8   : > { %846 = shalt.err (!%p843_p3)
}
 0x2a9   : > { %s888_s16 = smov 128   ;;  %s889_s25 = smov 8  }
 0x2aa   : > { %760 = dma.vmem_to_hbm [thread:$0]  (%p988_p5), %s671_s21, 512, %s673_s13, %s657_s14, %s888_s16, %s888_s16, %s889_s25  }
 0x2ab PF: > { %p766_p4 = scmp.ge.s32.totalorder %s881_s20, 2  ;;  %s687_s24 = sand.u32 1, %s869_s17  }
 0x2ac   : > { %s688_s0 = scalar_lea.sflag [#allocation4], %s687_s24 }
 0x2ad   : > { %p763_p7 = pnand %p766_p4, %p992_p6 }
 0x2af   : > { %p764_p8 = pneg %p763_p7 }
 0x2b1   : > { %864 = dma.done.wait (%p764_p8), %s688_s0, 512  }
 0x2b2   : > { %866 = vsyncadd (%p764_p8), %s688_s0, 4294966784  ;;  %p21_p9 = scmp.ge.s32.totalorder %s975_s23, 4   ;;  %s1100_s17 = smov %s873_s18 }
 0x2b3   : > { %s1101_s18 = smov %s877_s19  ;;  %s1102_s19 = smov %s986_s26 }
 0x2b4   : > { %s1103_s20 = smov %s975_s23  ;;  %23 = sbr.rel (!%p21_p9) target bundleno = 5 (0x5), region = 99 }
 0x2b9   :  { %694 = vsyncpa [#allocation4], 1 }
 0x2ba   :  { %696 = vsyncpa [#allocation4 + $0x1], 1 }

</bundles_post_ra>
